<compile_context>
chip_gen: v6e
topology: v6e:2x2x1
jax: 0.10.0
libtpu: 0.0.40
codegen_flags: <defaults>
</compile_context>

<pallas_src>
import jax
import jax.numpy as jnp
from jax.experimental import pallas as pl
from jax.experimental.pallas import tpu as pltpu


def _round_up(x, m):
    return (x + m - 1) // m * m


# ---------------------------------------------------------------------------
# Kernel 1: additive attention + context + single-step GRU cell (all resident).
# ---------------------------------------------------------------------------
def attn_gru_kernel(h_ref, emb_ref, enc_ref, epart_ref, attn_wh_ref,
                    w_ih_e_ref, w_ih_c_ref, b_ih_ref, w_hh_ref, b_hh_ref,
                    ctx_ref, hnew_ref):
    f32 = jnp.float32
    h = h_ref[...]                 # [B, D]
    embedded = emb_ref[...]        # [B, EMB]
    enc = enc_ref[...]             # [B, S, 2E]

    # --- additive attention.  epart = enc @ We + b_attn is precomputed once per
    # sequence in the wrapper; only the decoder-hidden projection is per-step.
    h_part = jnp.dot(h, attn_wh_ref[...], preferred_element_type=f32)    # [B, A]
    energy = jnp.tanh(h_part[:, None, :] + epart_ref[...])               # [B, S, A]
    scores = jnp.sum(energy, axis=-1)                                    # [B, S]

    m = jnp.max(scores, axis=-1, keepdims=True)
    e = jnp.exp(scores - m)
    a = e / jnp.sum(e, axis=-1, keepdims=True)                           # [B, S]

    # weighted context (tiny VPU/XLU work at these sizes).
    ctx = jnp.sum(a[:, :, None] * enc, axis=1)                           # [B, 2E]

    # --- single-step GRU cell (PyTorch gate order r, z, n).  Weights carry the
    # gate index on a leading axis so no lane-axis slicing is needed.
    # (rnn_input concat [embedded, ctx] is kept as split-K dots to avoid an
    #  in-kernel lane-axis concatenate.)
    def gate(g):
        gi = (jnp.dot(embedded, w_ih_e_ref[g], preferred_element_type=f32)
              + jnp.dot(ctx, w_ih_c_ref[g], preferred_element_type=f32)
              + b_ih_ref[g])
        gh = jnp.dot(h, w_hh_ref[g], preferred_element_type=f32) + b_hh_ref[g]
        return gi, gh

    gi_r, gh_r = gate(0)
    gi_z, gh_z = gate(1)
    gi_n, gh_n = gate(2)
    r = jax.nn.sigmoid(gi_r + gh_r)
    z = jax.nn.sigmoid(gi_z + gh_z)
    n = jnp.tanh(gi_n + r * gh_n)
    h_new = (1.0 - z) * n + z * h                                        # [B, D]

    ctx_ref[...] = ctx
    hnew_ref[...] = h_new


# ---------------------------------------------------------------------------
# Kernel 2: output projection over cat([h_new, ctx, embedded]), tiled over V.
# Weight tiles stream from HBM as bf16 (double-buffered by the BlockSpec grid).
# ---------------------------------------------------------------------------
def out_proj_kernel(x_ref, w_ref, b_ref, pred_ref):
    x = x_ref[...].astype(w_ref.dtype)          # bf16 activations -> bf16 MXU path
    pred_ref[...] = (jnp.dot(x, w_ref[...], preferred_element_type=jnp.float32)
                     + b_ref[...])


# ---------------------------------------------------------------------------
# One-time weight relayout (hoist outside any decode loop).
# ---------------------------------------------------------------------------
def prepare_params(params):
    D = params["w_hh"].shape[1]
    EMB = params["embedding"].shape[1]
    V = params["out_b"].shape[0]
    attn_in = params["attn_w"].shape[1]
    E2 = attn_in - D
    K = D + E2 + EMB

    # attention linear: PyTorch [A, D+2E], concat order [hidden; enc]
    attn_wt = params["attn_w"].T.astype(jnp.float32)          # [D+2E, A]
    attn_wh, attn_we = attn_wt[:D], attn_wt[D:]

    # GRU weights: [3D, in] -> per-gate stacks with leading gate axis (r, z, n)
    w_ih_t = params["w_ih"].T                                  # [EMB+2E, 3D]
    w_hh_t = params["w_hh"].T                                  # [D, 3D]
    w_ih_e_g = jnp.stack([w_ih_t[:EMB, g * D:(g + 1) * D] for g in range(3)])
    w_ih_c_g = jnp.stack([w_ih_t[EMB:, g * D:(g + 1) * D] for g in range(3)])
    w_hh_g = jnp.stack([w_hh_t[:, g * D:(g + 1) * D] for g in range(3)])
    b_ih_g = params["b_ih"].reshape(3, 1, D).astype(jnp.float32)
    b_hh_g = params["b_hh"].reshape(3, 1, D).astype(jnp.float32)

    # output projection: pad V to a multiple of the tile width (lane-dense pred
    # stores), cast the streamed weight to bf16 (halves HBM bytes).
    TV = 256 if V >= 256 else _round_up(V, 128)
    V_pad = _round_up(V, TV)
    out_wt = params["out_w"].T                                 # [K, V]
    out_w_pad = jnp.zeros((K, V_pad), jnp.float32).at[:, :V].set(out_wt)
    out_w_bf16 = out_w_pad.astype(jnp.bfloat16)
    out_b_pad = jnp.zeros((1, V_pad), jnp.float32).at[0, :V].set(params["out_b"])

    return dict(embedding=params["embedding"].astype(jnp.float32),
                attn_wh=attn_wh, attn_we=attn_we,
                attn_b=params["attn_b"].astype(jnp.float32),
                w_ih_e_g=w_ih_e_g, w_ih_c_g=w_ih_c_g,
                b_ih_g=b_ih_g, w_hh_g=w_hh_g, b_hh_g=b_hh_g,
                out_w=out_w_bf16, out_b=out_b_pad,
                dims=dict(D=D, EMB=EMB, E2=E2, V=V, V_pad=V_pad, TV=TV, K=K))


# ---------------------------------------------------------------------------
# Once-per-sequence encoder-side work (constant across decode steps).
# ---------------------------------------------------------------------------
def prepare_encoder(encoder_outputs, prep):
    enc_bse = jnp.transpose(encoder_outputs, (1, 0, 2)).astype(jnp.float32)  # [B,S,2E]
    e_part = enc_bse @ prep["attn_we"] + prep["attn_b"]                      # [B,S,A]
    return enc_bse, e_part


# ---------------------------------------------------------------------------
# One decode step (the per-token forward of the PyTorch module).
# ---------------------------------------------------------------------------
def decoder_step(tokens, decoder_hidden, enc_bse, e_part, prep):
    dims = prep["dims"]
    B = tokens.shape[0]
    D, E2 = dims["D"], dims["E2"]
    V, V_pad, TV, K = dims["V"], dims["V_pad"], dims["TV"], dims["K"]

    h = decoder_hidden[-1]                                     # [B, D]
    # embedding lookup via XLA gather; dropout = identity (eval mode)
    embedded = prep["embedding"][tokens]                       # [B, EMB]

    vmem = pl.BlockSpec(memory_space=pltpu.MemorySpace.VMEM)
    ctx, h_new = pl.pallas_call(
        attn_gru_kernel,
        out_shape=(jax.ShapeDtypeStruct((B, E2), jnp.float32),
                   jax.ShapeDtypeStruct((B, D), jnp.float32)),
        in_specs=[vmem] * 10,
        out_specs=(vmem, vmem),
    )(h, embedded, enc_bse, e_part, prep["attn_wh"],
      prep["w_ih_e_g"], prep["w_ih_c_g"], prep["b_ih_g"],
      prep["w_hh_g"], prep["b_hh_g"])

    # Fused output projection over cat([rnn_output, ctx, embedded]); tiled over V.
    xcat = jnp.concatenate([h_new, ctx, embedded], axis=1)     # [B, K]
    nv = V_pad // TV
    pred_pad = pl.pallas_call(
        out_proj_kernel,
        out_shape=jax.ShapeDtypeStruct((B, V_pad), jnp.float32),
        grid=(nv,),
        in_specs=[pl.BlockSpec((B, K), lambda j: (0, 0)),      # resident activations
                  pl.BlockSpec((K, TV), lambda j: (0, j)),     # streamed bf16 weight
                  pl.BlockSpec((1, TV), lambda j: (0, j))],    # streamed bias
        out_specs=pl.BlockSpec((B, TV), lambda j: (0, j)),     # lane-dense pred tile
        compiler_params=pltpu.CompilerParams(
            dimension_semantics=("parallel",),                 # v7x: shard V over 2 TCs
            vmem_limit_bytes=32 * 1024 * 1024),                # safe on 64 MiB v7x VMEM
    )(xcat, prep["out_w"], prep["out_b"])

    pred = pred_pad[:, :V]                                     # drop zero-padded logits
    return pred, h_new[None]                                   # ([B,V], [1,B,D])


def decoder_with_attention(tokens, decoder_hidden, encoder_outputs, params):
    """tokens: [B] int32; decoder_hidden: [1, B, D]; encoder_outputs: [S, B, 2E]."""
    prep = prepare_params(params)                 # hoist out of real decode loops
    enc_bse, e_part = prepare_encoder(encoder_outputs, prep)
    return decoder_step(tokens, decoder_hidden, enc_bse, e_part, prep)


# ---------------------------------------------------------------------------
# Pure-JAX f32 reference mirroring the PyTorch forward (correctness check).
# ---------------------------------------------------------------------------
def reference_forward(tokens, decoder_hidden, encoder_outputs, params):
    h = decoder_hidden[-1]                                     # [B, D]
    embedded = params["embedding"][tokens]                     # [B, EMB]
    enc = jnp.transpose(encoder_outputs, (1, 0, 2))            # [B, S, 2E]
    B, S, _ = enc.shape
    rep_h = jnp.broadcast_to(h[:, None, :], (B, S, h.shape[1]))
    energy = jnp.tanh(jnp.concatenate([rep_h, enc], axis=2) @ params["attn_w"].T
                      + params["attn_b"])
    a = jax.nn.softmax(jnp.sum(energy, axis=2), axis=1)        # [B, S]
    ctx = jnp.einsum("bs,bse->be", a, enc)                     # [B, 2E]
    x = jnp.concatenate([embedded, ctx], axis=1)
    D = h.shape[1]
    gi = x @ params["w_ih"].T + params["b_ih"]
    gh = h @ params["w_hh"].T + params["b_hh"]
    r = jax.nn.sigmoid(gi[:, :D] + gh[:, :D])
    z = jax.nn.sigmoid(gi[:, D:2 * D] + gh[:, D:2 * D])
    n = jnp.tanh(gi[:, 2 * D:] + r * gh[:, 2 * D:])
    h_new = (1.0 - z) * n + z * h
    concat = jnp.concatenate([h_new, ctx, embedded], axis=1)
    pred = concat @ params["out_w"].T + params["out_b"]
    return pred, h_new[None]


if __name__ == "__main__":
    # Small shapes consistent with the module
    B, S = 4, 8
    V, EMB = 32, 16            # output_dim, emb_dim
    ENC, DEC, A = 32, 32, 24   # enc_hid_dim, dec_hid_dim, attention dim
    E2 = 2 * ENC
    ATTN_IN = E2 + DEC

    key = jax.random.PRNGKey(0)
    ks = jax.random.split(key, 16)

    def u(k, shape, scale=0.1):
        return jax.random.uniform(k, shape, jnp.float32, -scale, scale)

    params = {
        "embedding": u(ks[0], (V, EMB)),
        "attn_w": u(ks[1], (A, ATTN_IN)),
        "attn_b": u(ks[2], (A,)),
        "w_ih": u(ks[3], (3 * DEC, E2 + EMB)),
        "w_hh": u(ks[4], (3 * DEC, DEC)),
        "b_ih": u(ks[5], (3 * DEC,)),
        "b_hh": u(ks[6], (3 * DEC,)),
        "out_w": u(ks[7], (V, ATTN_IN + EMB)),
        "out_b": u(ks[8], (V,)),
    }

    tokens = jax.random.randint(ks[9], (B,), 0, V, dtype=jnp.int32)
    decoder_hidden = u(ks[10], (1, B, DEC), 1.0)
    encoder_outputs = u(ks[11], (S, B, E2), 1.0)

    pred, rnn_hidden = decoder_with_attention(tokens, decoder_hidden,
                                              encoder_outputs, params)
    pred = jax.block_until_ready(pred)
    rnn_hidden = jax.block_until_ready(rnn_hidden)

    ref_pred, ref_hidden = reference_forward(tokens, decoder_hidden,
                                             encoder_outputs, params)
    assert pred.shape == (B, V) and rnn_hidden.shape == (1, B, DEC)
    # hidden path stays f32 -> tight tolerance
    assert jnp.allclose(rnn_hidden, ref_hidden, rtol=1e-4, atol=1e-4)
    # prediction uses a bf16 weight stream -> looser tolerance vs f32 reference
    assert jnp.allclose(pred, ref_pred, rtol=3e-2, atol=3e-2)

    print("KERNEL_OK")
</pallas_src>

<mosaic_0001>
module attributes {stable_mosaic.version = 11 : i64} {
  func.func @attn_gru_kernel(%arg0: memref<4x32xf32, #tpu.memory_space<vmem>>, %arg1: memref<4x16xf32, #tpu.memory_space<vmem>>, %arg2: memref<4x8x64xf32, #tpu.memory_space<vmem>>, %arg3: memref<4x8x24xf32, #tpu.memory_space<vmem>>, %arg4: memref<32x24xf32, #tpu.memory_space<vmem>>, %arg5: memref<3x16x32xf32, #tpu.memory_space<vmem>>, %arg6: memref<3x64x32xf32, #tpu.memory_space<vmem>>, %arg7: memref<3x1x32xf32, #tpu.memory_space<vmem>>, %arg8: memref<3x32x32xf32, #tpu.memory_space<vmem>>, %arg9: memref<3x1x32xf32, #tpu.memory_space<vmem>>, %arg10: memref<4x64xf32, #tpu.memory_space<vmem>>, %arg11: memref<4x32xf32, #tpu.memory_space<vmem>>) attributes {dimension_semantics = [], scalar_prefetch = 0 : i64, scratch_operands = 0 : i64, tpu.core_type = #tpu.core_type<tc>} {
    %c0 = arith.constant 0 : index
    %c0_0 = arith.constant 0 : index
    %0 = vector.load %arg0[%c0, %c0_0] : memref<4x32xf32, #tpu.memory_space<vmem>>, vector<4x32xf32>
    %c0_1 = arith.constant 0 : index
    %c0_2 = arith.constant 0 : index
    %1 = vector.load %arg1[%c0_1, %c0_2] : memref<4x16xf32, #tpu.memory_space<vmem>>, vector<4x16xf32>
    %c0_3 = arith.constant 0 : index
    %c0_4 = arith.constant 0 : index
    %c0_5 = arith.constant 0 : index
    %2 = vector.load %arg2[%c0_3, %c0_4, %c0_5] : memref<4x8x64xf32, #tpu.memory_space<vmem>>, vector<4x8x64xf32>
    %c0_6 = arith.constant 0 : index
    %c0_7 = arith.constant 0 : index
    %3 = vector.load %arg4[%c0_6, %c0_7] : memref<32x24xf32, #tpu.memory_space<vmem>>, vector<32x24xf32>
    %cst = arith.constant dense<0.000000e+00> : vector<4x24xf32>
    %4 = tpu.matmul %0, %3, %cst {dimension_numbers = #tpu.dot_dimension_numbers<[1], [0], [0], [1], [0, 0, 1, 1], [], []>} : vector<4x32xf32>, vector<32x24xf32>, vector<4x24xf32> -> vector<4x24xf32>
    %5 = vector.shape_cast %4 : vector<4x24xf32> to vector<4x1x24xf32>
    %c0_8 = arith.constant 0 : index
    %c0_9 = arith.constant 0 : index
    %c0_10 = arith.constant 0 : index
    %6 = vector.load %arg3[%c0_8, %c0_9, %c0_10] : memref<4x8x24xf32, #tpu.memory_space<vmem>>, vector<4x8x24xf32>
    %7 = vector.broadcast %5 : vector<4x1x24xf32> to vector<4x8x24xf32>
    %8 = arith.addf %7, %6 : vector<4x8x24xf32>
    %9 = math.tanh %8 : vector<4x8x24xf32>
    %cst_11 = arith.constant dense<0.000000e+00> : vector<4x8xf32>
    %10 = vector.multi_reduction <add>, %9, %cst_11 [2] : vector<4x8x24xf32> to vector<4x8xf32>
    %cst_12 = arith.constant dense<0xFF800000> : vector<4xf32>
    %11 = vector.multi_reduction <maximumf>, %10, %cst_12 [1] : vector<4x8xf32> to vector<4xf32>
    %12 = vector.shape_cast %11 : vector<4xf32> to vector<4x1xf32>
    %13 = vector.broadcast %12 : vector<4x1xf32> to vector<4x8xf32>
    %14 = arith.subf %10, %13 : vector<4x8xf32>
    %15 = math.exp %14 : vector<4x8xf32>
    %cst_13 = arith.constant dense<0.000000e+00> : vector<4xf32>
    %16 = vector.multi_reduction <add>, %15, %cst_13 [1] : vector<4x8xf32> to vector<4xf32>
    %17 = vector.shape_cast %16 : vector<4xf32> to vector<4x1xf32>
    %18 = vector.broadcast %17 : vector<4x1xf32> to vector<4x8xf32>
    %19 = arith.divf %15, %18 : vector<4x8xf32>
    %20 = vector.shape_cast %19 : vector<4x8xf32> to vector<4x8x1xf32>
    %21 = vector.broadcast %20 : vector<4x8x1xf32> to vector<4x8x64xf32>
    %22 = arith.mulf %21, %2 : vector<4x8x64xf32>
    %cst_14 = arith.constant dense<0.000000e+00> : vector<4x64xf32>
    %23 = vector.multi_reduction <add>, %22, %cst_14 [1] : vector<4x8x64xf32> to vector<4x64xf32>
    %c0_15 = arith.constant 0 : index
    %c0_16 = arith.constant 0 : index
    %c0_17 = arith.constant 0 : index
    %24 = vector.load %arg5[%c0_15, %c0_16, %c0_17] : memref<3x16x32xf32, #tpu.memory_space<vmem>>, vector<1x16x32xf32>
    %25 = vector.shape_cast %24 : vector<1x16x32xf32> to vector<16x32xf32>
    %cst_18 = arith.constant dense<0.000000e+00> : vector<4x32xf32>
    %26 = tpu.matmul %1, %25, %cst_18 {dimension_numbers = #tpu.dot_dimension_numbers<[1], [0], [0], [1], [0, 0, 1, 1], [], []>} : vector<4x16xf32>, vector<16x32xf32>, vector<4x32xf32> -> vector<4x32xf32>
    %c0_19 = arith.constant 0 : index
    %c0_20 = arith.constant 0 : index
    %c0_21 = arith.constant 0 : index
    %27 = vector.load %arg6[%c0_19, %c0_20, %c0_21] : memref<3x64x32xf32, #tpu.memory_space<vmem>>, vector<1x64x32xf32>
    %28 = vector.shape_cast %27 : vector<1x64x32xf32> to vector<64x32xf32>
    %cst_22 = arith.constant dense<0.000000e+00> : vector<4x32xf32>
    %29 = tpu.matmul %23, %28, %cst_22 {dimension_numbers = #tpu.dot_dimension_numbers<[1], [0], [0], [1], [0, 0, 1, 1], [], []>} : vector<4x64xf32>, vector<64x32xf32>, vector<4x32xf32> -> vector<4x32xf32>
    %30 = arith.addf %26, %29 : vector<4x32xf32>
    %c0_23 = arith.constant 0 : index
    %c0_24 = arith.constant 0 : index
    %c0_25 = arith.constant 0 : index
    %31 = vector.load %arg7[%c0_23, %c0_24, %c0_25] : memref<3x1x32xf32, #tpu.memory_space<vmem>>, vector<1x1x32xf32>
    %32 = vector.shape_cast %31 : vector<1x1x32xf32> to vector<1x32xf32>
    %33 = vector.broadcast %32 : vector<1x32xf32> to vector<4x32xf32>
    %34 = arith.addf %30, %33 : vector<4x32xf32>
    %c0_26 = arith.constant 0 : index
    %c0_27 = arith.constant 0 : index
    %c0_28 = arith.constant 0 : index
    %35 = vector.load %arg8[%c0_26, %c0_27, %c0_28] : memref<3x32x32xf32, #tpu.memory_space<vmem>>, vector<1x32x32xf32>
    %36 = vector.shape_cast %35 : vector<1x32x32xf32> to vector<32x32xf32>
    %cst_29 = arith.constant dense<0.000000e+00> : vector<4x32xf32>
    %37 = tpu.matmul %0, %36, %cst_29 {dimension_numbers = #tpu.dot_dimension_numbers<[1], [0], [0], [1], [0, 0, 1, 1], [], []>} : vector<4x32xf32>, vector<32x32xf32>, vector<4x32xf32> -> vector<4x32xf32>
    %c0_30 = arith.constant 0 : index
    %c0_31 = arith.constant 0 : index
    %c0_32 = arith.constant 0 : index
    %38 = vector.load %arg9[%c0_30, %c0_31, %c0_32] : memref<3x1x32xf32, #tpu.memory_space<vmem>>, vector<1x1x32xf32>
    %39 = vector.shape_cast %38 : vector<1x1x32xf32> to vector<1x32xf32>
    %40 = vector.broadcast %39 : vector<1x32xf32> to vector<4x32xf32>
    %41 = arith.addf %37, %40 : vector<4x32xf32>
    %c1 = arith.constant 1 : index
    %c0_33 = arith.constant 0 : index
    %c0_34 = arith.constant 0 : index
    %42 = vector.load %arg5[%c1, %c0_33, %c0_34] : memref<3x16x32xf32, #tpu.memory_space<vmem>>, vector<1x16x32xf32>
    %43 = vector.shape_cast %42 : vector<1x16x32xf32> to vector<16x32xf32>
    %cst_35 = arith.constant dense<0.000000e+00> : vector<4x32xf32>
    %44 = tpu.matmul %1, %43, %cst_35 {dimension_numbers = #tpu.dot_dimension_numbers<[1], [0], [0], [1], [0, 0, 1, 1], [], []>} : vector<4x16xf32>, vector<16x32xf32>, vector<4x32xf32> -> vector<4x32xf32>
    %c1_36 = arith.constant 1 : index
    %c0_37 = arith.constant 0 : index
    %c0_38 = arith.constant 0 : index
    %45 = vector.load %arg6[%c1_36, %c0_37, %c0_38] : memref<3x64x32xf32, #tpu.memory_space<vmem>>, vector<1x64x32xf32>
    %46 = vector.shape_cast %45 : vector<1x64x32xf32> to vector<64x32xf32>
    %cst_39 = arith.constant dense<0.000000e+00> : vector<4x32xf32>
    %47 = tpu.matmul %23, %46, %cst_39 {dimension_numbers = #tpu.dot_dimension_numbers<[1], [0], [0], [1], [0, 0, 1, 1], [], []>} : vector<4x64xf32>, vector<64x32xf32>, vector<4x32xf32> -> vector<4x32xf32>
    %48 = arith.addf %44, %47 : vector<4x32xf32>
    %c1_40 = arith.constant 1 : index
    %c0_41 = arith.constant 0 : index
    %c0_42 = arith.constant 0 : index
    %49 = vector.load %arg7[%c1_40, %c0_41, %c0_42] : memref<3x1x32xf32, #tpu.memory_space<vmem>>, vector<1x1x32xf32>
    %50 = vector.shape_cast %49 : vector<1x1x32xf32> to vector<1x32xf32>
    %51 = vector.broadcast %50 : vector<1x32xf32> to vector<4x32xf32>
    %52 = arith.addf %48, %51 : vector<4x32xf32>
    %c1_43 = arith.constant 1 : index
    %c0_44 = arith.constant 0 : index
    %c0_45 = arith.constant 0 : index
    %53 = vector.load %arg8[%c1_43, %c0_44, %c0_45] : memref<3x32x32xf32, #tpu.memory_space<vmem>>, vector<1x32x32xf32>
    %54 = vector.shape_cast %53 : vector<1x32x32xf32> to vector<32x32xf32>
    %cst_46 = arith.constant dense<0.000000e+00> : vector<4x32xf32>
    %55 = tpu.matmul %0, %54, %cst_46 {dimension_numbers = #tpu.dot_dimension_numbers<[1], [0], [0], [1], [0, 0, 1, 1], [], []>} : vector<4x32xf32>, vector<32x32xf32>, vector<4x32xf32> -> vector<4x32xf32>
    %c1_47 = arith.constant 1 : index
    %c0_48 = arith.constant 0 : index
    %c0_49 = arith.constant 0 : index
    %56 = vector.load %arg9[%c1_47, %c0_48, %c0_49] : memref<3x1x32xf32, #tpu.memory_space<vmem>>, vector<1x1x32xf32>
    %57 = vector.shape_cast %56 : vector<1x1x32xf32> to vector<1x32xf32>
    %58 = vector.broadcast %57 : vector<1x32xf32> to vector<4x32xf32>
    %59 = arith.addf %55, %58 : vector<4x32xf32>
    %c2 = arith.constant 2 : index
    %c0_50 = arith.constant 0 : index
    %c0_51 = arith.constant 0 : index
    %60 = vector.load %arg5[%c2, %c0_50, %c0_51] : memref<3x16x32xf32, #tpu.memory_space<vmem>>, vector<1x16x32xf32>
    %61 = vector.shape_cast %60 : vector<1x16x32xf32> to vector<16x32xf32>
    %cst_52 = arith.constant dense<0.000000e+00> : vector<4x32xf32>
    %62 = tpu.matmul %1, %61, %cst_52 {dimension_numbers = #tpu.dot_dimension_numbers<[1], [0], [0], [1], [0, 0, 1, 1], [], []>} : vector<4x16xf32>, vector<16x32xf32>, vector<4x32xf32> -> vector<4x32xf32>
    %c2_53 = arith.constant 2 : index
    %c0_54 = arith.constant 0 : index
    %c0_55 = arith.constant 0 : index
    %63 = vector.load %arg6[%c2_53, %c0_54, %c0_55] : memref<3x64x32xf32, #tpu.memory_space<vmem>>, vector<1x64x32xf32>
    %64 = vector.shape_cast %63 : vector<1x64x32xf32> to vector<64x32xf32>
    %cst_56 = arith.constant dense<0.000000e+00> : vector<4x32xf32>
    %65 = tpu.matmul %23, %64, %cst_56 {dimension_numbers = #tpu.dot_dimension_numbers<[1], [0], [0], [1], [0, 0, 1, 1], [], []>} : vector<4x64xf32>, vector<64x32xf32>, vector<4x32xf32> -> vector<4x32xf32>
    %66 = arith.addf %62, %65 : vector<4x32xf32>
    %c2_57 = arith.constant 2 : index
    %c0_58 = arith.constant 0 : index
    %c0_59 = arith.constant 0 : index
    %67 = vector.load %arg7[%c2_57, %c0_58, %c0_59] : memref<3x1x32xf32, #tpu.memory_space<vmem>>, vector<1x1x32xf32>
    %68 = vector.shape_cast %67 : vector<1x1x32xf32> to vector<1x32xf32>
    %69 = vector.broadcast %68 : vector<1x32xf32> to vector<4x32xf32>
    %70 = arith.addf %66, %69 : vector<4x32xf32>
    %c2_60 = arith.constant 2 : index
    %c0_61 = arith.constant 0 : index
    %c0_62 = arith.constant 0 : index
    %71 = vector.load %arg8[%c2_60, %c0_61, %c0_62] : memref<3x32x32xf32, #tpu.memory_space<vmem>>, vector<1x32x32xf32>
    %72 = vector.shape_cast %71 : vector<1x32x32xf32> to vector<32x32xf32>
    %cst_63 = arith.constant dense<0.000000e+00> : vector<4x32xf32>
    %73 = tpu.matmul %0, %72, %cst_63 {dimension_numbers = #tpu.dot_dimension_numbers<[1], [0], [0], [1], [0, 0, 1, 1], [], []>} : vector<4x32xf32>, vector<32x32xf32>, vector<4x32xf32> -> vector<4x32xf32>
    %c2_64 = arith.constant 2 : index
    %c0_65 = arith.constant 0 : index
    %c0_66 = arith.constant 0 : index
    %74 = vector.load %arg9[%c2_64, %c0_65, %c0_66] : memref<3x1x32xf32, #tpu.memory_space<vmem>>, vector<1x1x32xf32>
    %75 = vector.shape_cast %74 : vector<1x1x32xf32> to vector<1x32xf32>
    %76 = vector.broadcast %75 : vector<1x32xf32> to vector<4x32xf32>
    %77 = arith.addf %73, %76 : vector<4x32xf32>
    %78 = arith.addf %34, %41 : vector<4x32xf32>
    %79 = arith.negf %78 : vector<4x32xf32>
    %80 = math.exp %79 : vector<4x32xf32>
    %cst_67 = arith.constant 1.000000e+00 : f32
    %81 = vector.broadcast %cst_67 : f32 to vector<4x32xf32>
    %82 = arith.addf %81, %80 : vector<4x32xf32>
    %83 = arith.divf %81, %82 : vector<4x32xf32>
    %84 = arith.addf %52, %59 : vector<4x32xf32>
    %85 = arith.negf %84 : vector<4x32xf32>
    %86 = math.exp %85 : vector<4x32xf32>
    %cst_68 = arith.constant 1.000000e+00 : f32
    %87 = vector.broadcast %cst_68 : f32 to vector<4x32xf32>
    %88 = arith.addf %87, %86 : vector<4x32xf32>
    %89 = arith.divf %87, %88 : vector<4x32xf32>
    %90 = arith.mulf %83, %77 : vector<4x32xf32>
    %91 = arith.addf %70, %90 : vector<4x32xf32>
    %92 = math.tanh %91 : vector<4x32xf32>
    %cst_69 = arith.constant 1.000000e+00 : f32
    %93 = vector.broadcast %cst_69 : f32 to vector<4x32xf32>
    %94 = arith.subf %93, %89 : vector<4x32xf32>
    %95 = arith.mulf %94, %92 : vector<4x32xf32>
    %96 = arith.mulf %89, %0 : vector<4x32xf32>
    %97 = arith.addf %95, %96 : vector<4x32xf32>
    %c0_70 = arith.constant 0 : index
    %c0_71 = arith.constant 0 : index
    %98 = vector.load %arg10[%c0_70, %c0_71] : memref<4x64xf32, #tpu.memory_space<vmem>>, vector<4x64xf32>
    tpu.vector_store %arg10[%c0_70, %c0_71], %23 {strides = array<i32>} : memref<4x64xf32, #tpu.memory_space<vmem>>, vector<4x64xf32>,
    %c0_72 = arith.constant 0 : index
    %c0_73 = arith.constant 0 : index
    %99 = vector.load %arg11[%c0_72, %c0_73] : memref<4x32xf32, #tpu.memory_space<vmem>>, vector<4x32xf32>
    tpu.vector_store %arg11[%c0_72, %c0_73], %97 {strides = array<i32>} : memref<4x32xf32, #tpu.memory_space<vmem>>, vector<4x32xf32>,
    return
  }
}

</mosaic_0001>

<bundles_post_ra>
// kernel: tpu_custom_call.1
= control target key start
LH: loop header
LB: loop body
LE: loop exit
PB: predicated region body
PF: predicated region fallthrough
CT: control target
= control target key end

     0   :  { %17 = vsyncpa [#allocation3], 0  ;;  %v1488_v1 = vmov 0.0   ;;  %vm1489_vm0 = vmmov 0   ;;  %s1891_s0 = inlined_call_operand.vmem [shape: f32[4,32], index: 0, kind: input, shape index: {}]   ;;  %s1892_s1 = inlined_call_operand.vmem [shape: f32[4,16], index: 1, kind: input, shape index: {}]   ;;  %s1893_s2 = inlined_call_operand.vmem [shape: f32[4,8,64], index: 2, kind: input, shape index: {}]   ;;  %s1894_s3 = inlined_call_operand.vmem [shape: f32[4,8,24], index: 3, kind: input, shape index: {}]   ;;  %s1895_s4 = inlined_call_operand.vmem [shape: f32[32,24], index: 4, kind: input, shape index: {}]   ;;  %s1896_s5 = inlined_call_operand.vmem [shape: f32[3,16,32], index: 5, kind: input, shape index: {}]   ;;  %s1897_s6 = inlined_call_operand.vmem [shape: f32[3,64,32], index: 6, kind: input, shape index: {}]   ;;  %s1898_s7 = inlined_call_operand.vmem [shape: f32[3,1,32], index: 7, kind: input, shape index: {}]   ;;  %s1899_s8 = inlined_call_operand.vmem [shape: f32[3,32,32], index: 8, kind: input, shape index: {}]   ;;  %s1900_s9 = inlined_call_operand.vmem [shape: f32[3,1,32], index: 9, kind: input, shape index: {}]   ;;  %s1901_s10 = inlined_call_operand.hbm [shape: f32[4,64], index: 10, kind: output, shape index: {0}]   ;;  %s1902_s11 = inlined_call_operand.hbm [shape: f32[4,32], index: 11, kind: output, shape index: {1}]  }
   0x1   :  { %v48_v0 = vld [vmem:[%s1895_s4 + $0x18] sm:$0xff]  ;;  %1280 = vmatprep.subr.mxu0 %v1488_v1  ;;  %v47_v2 = vld [vmem:[%s1895_s4 + $0x10] sm:$0xff]  ;;  %1288 = vmatprep.mubr.msk.f32.mxu0 %vm1489_vm0, %v1488_v1 }
   0x2   :  { %18 = vsyncpa [#allocation5], 0  ;;  %1281 = vmatpush3.msra.mxu0 %v48_v0  ;;  %1291 = vmatprep.subr.mxu1 %v1488_v1  ;;  %v46_v3 = vld [vmem:[%s1895_s4 + $0x8] sm:$0xff]  ;;  %v45_v4 = vld [vmem:[%s1895_s4] sm:$0xff]  ;;  %vm49_vm1 = vcmask 261120   ;;  %v127_v8 = vlaneseq  ;;  %vm180_vm2 = vcmask 195584  }
   0x3   :  { %1282 = vmatprep.subr.mxu0 %v1488_v1  ;;  %1307 = vmatprep.mubr.msk.f32.mxu1 %vm1489_vm0, %v1488_v1  ;;  %v1577_v5 = vld [vmem:[%s1891_s0] sm:$0xf]  ;;  %v1490_v6 = vmov 1966171168   ;;  %v149_v22 = vld [vmem:[%s1894_s3 + $0x8] sm:$0xff]  ;;  %v150_v23 = vld [vmem:[%s1894_s3 + $0x10] sm:$0xff] }
   0x4   :  { %1283 = vmatpush3.msra.mxu0 %v47_v2  ;;  %v125_v7 = vunpack.c.l.s4 %v1490_v6  ;;  %v1585_v10 = vshrl.u32 %v127_v8, 7  ;;  %v148_v18 = vld [vmem:[%s1894_s3] sm:$0xff]  ;;  %v151_v28 = vld [vmem:[%s1894_s3 + $0x18] sm:$0xff]  ;;  %v198_v41 = vand.u32 127, %v127_v8  ;;  %vm215_vm3 = vcmask 1041409   ;;  %s1492_s12 = smov [#allocation2]  }
   0x5   :  { %1284 = vmatprep.subr.mxu0 %v1488_v1  ;;  %vm217_vm4 = vcmask 1042434   ;;  %vm219_vm5 = vcmask 1043459   ;;  %vm222_vm6 = vcmask 60416   ;;  %v1491_v55 = vmov 0   ;;  %s1152_s13 = sshll.u32 %s1492_s12, 4  ;;  %s1153_s13 = int_to_ptr.vmem [resolvable:$true] %s1152_s13 }
   0x6   :  { %1285 = vmatpush3.msra.mxu0 %v46_v3  ;;  %v126_v9 = vunpack.c.0.s8 %v125_v7  ;;  %v1589_v14 = vsub.s32 0, %v1585_v10  ;;  %v201_v43 = vsub.s32 %v198_v41, %v1585_v10  ;;  %1409 = vset.pattern.permute.xlu0 %v1491_v55  ;;  %v233_v56 = vsub.s32 1, %v1585_v10  ;;  %s1444_s3 = scalar_lea.vmem %s1153_s13, 64  ;;  %p1449_p1 = scmp.lt.s32.totalorder %s1153_s13, %s1153_s13 }
   0x7   :  { %1286 = vmatprep.subr.mxu0 %v1488_v1  ;;  %1408 = vset.pattern.permute.xlu1 %v1491_v55  ;;  %v237_v57 = vsub.s32 2, %v1585_v10  ;;  %v241_v58 = vsub.s32 3, %v1585_v10  ;;  %vm469_vm7 = vcmask 130048   ;;  %v1209_v55 = vld [vmem:[%s1897_s6 + $0xb0] sm:$0xff]  ;;  %vm351_vm8 = vcmask 523264   ;;  %p1445_p0 = scmp.ne.s32.totalorder %s1153_s13, %s1444_s3  ;;  %p1450_p2 = scmp.lt.s32.totalorder %s1444_s3, %s1444_s3 }
   0x8   :  { %1287 = vmatpush3.msra.mxu0 %v45_v4  ;;  %v129_v11 = vsub.s32 %v126_v9, %v1585_v10  ;;  %vm1142_vm9 = vcmask 519168  }
   0x9   :  { %1289 = vmatmul.mubr.msk.f32.vlgmr.msra.gmra.mxu0 %vm49_vm1, %v1577_v5  ;;  %1310 = vmatprep.subr.mxu0 %v1488_v1  ;;  %p1451_p3 = por %p1450_p2, %p1449_p1 }
   0xa   :  { %1314 = vmatprep.mubr.msk.f32.mxu0 %vm1489_vm0, %v1488_v1 }
   0xb   :  { %p1452_p4 = pnand %p1451_p3, %p1445_p0 }
  0xc9   :  { %v119_v12 = vpop.f32.mrf.mxu0 }
  0xca   :  { %v130_v13 = vrot.slane %v119_v12, %v129_v11 }
  0xcb   :  { %v1290_v15 = vpop.f32.mrf.mxu0 }
  0xcc   :  { %v131_v16 = vcombine.high %v130_v13, %v130_v13  ;;  %v138_v17 = vrot.slane %v130_v13, %v129_v11 }
  0xce   :  { %v145_v19 = vrot.slane %v131_v16, %v129_v11  ;;  %v146_v20 = vcombine.high %v138_v17, %v138_v17  ;;  %v155_v21 = vrot.slane %v138_v17, %v1589_v14 }
  0xd0   :  { %v147_v24 = vcombine.high %v145_v19, %v145_v19  ;;  %v159_v25 = vrot.slane %v145_v19, %v1589_v14  ;;  %v163_v26 = vrot.slane %v146_v20, %v1589_v14  ;;  %v172_v27 = vadd.f32 %v155_v21, %v148_v18 }
  0xd2   :  { %v167_v29 = vrot.slane %v147_v24, %v1589_v14  ;;  %v173_v30 = vadd.f32 %v159_v25, %v149_v22  ;;  %v174_v31 = vadd.f32 %v163_v26, %v150_v23  ;;  %1410 = vtanh.f32 %v172_v27 }
  0xd4   :  { %v175_v32 = vadd.f32 %v167_v29, %v151_v28  ;;  %1412 = vtanh.f32 %v173_v30  ;;  %v381_v28 = vld [vmem:[%s1896_s5 + $0x8] sm:$0xff]  ;;  %v380_v29 = vld [vmem:[%s1896_s5] sm:$0xff] }
  0xd5   :  { %1414 = vtanh.f32 %v174_v31  ;;  %1311 = vmatpush3.msra.mxu0 %v381_v28  ;;  %v1641_v30 = vld [vmem:[%s1892_s1] sm:$0xf]  ;;  %v554_v31 = vld [vmem:[%s1899_s8 + $0x18] sm:$0xff] }
  0xd6   :  { %1416 = vtanh.f32 %v175_v32  ;;  %1312 = vmatprep.subr.mxu0 %v1488_v1  ;;  %v553_v32 = vld [vmem:[%s1899_s8 + $0x10] sm:$0xff] }
  0xd7   :  { %1313 = vmatpush3.msra.mxu0 %v380_v29 }
  0xd8   :  { %1317 = vmatprep.subr.mxu0 %v1488_v1  ;;  %1315 = vmatmul.mubr.msk.f32.vlgmr.msra.gmra.mxu0 %vm469_vm7, %v1641_v30 }
  0xd9   :  { %1318 = vmatpush3.msra.mxu0 %v554_v31  ;;  %1325 = vmatprep.mubr.msk.f32.mxu0 %vm1489_vm0, %v1488_v1 }
  0xda   :  { %1319 = vmatprep.subr.mxu0 %v1488_v1 }
  0xdb   :  { %1320 = vmatpush3.msra.mxu0 %v553_v32 }
  0xdc   :  { %1321 = vmatprep.subr.mxu0 %v1488_v1 }
  0xdf   :  { %v1411_v33 = vpop.eup %1410 }
  0xe0   :  { %v181_v34 = vsel %vm180_vm2, %v1411_v33, 0.0  ;;  %v552_v33 = vld [vmem:[%s1899_s8 + $0x8] sm:$0xff] }
  0xe1   :  { %v1413_v35 = vpop.eup %1412  ;;  %182 = vadd.xlane.f32.xlu0 %v181_v34  ;;  %v551_v34 = vld [vmem:[%s1899_s8] sm:$0xff]  ;;  %1322 = vmatpush3.msra.mxu0 %v552_v33 }
  0xe2   :  { %v1415_v36 = vpop.eup %1414  ;;  %v184_v39 = vsel %vm180_vm2, %v1413_v35, 0.0  ;;  %1323 = vmatprep.subr.mxu0 %v1488_v1 }
  0xe3   :  { %v187_v37 = vsel %vm180_vm2, %v1415_v36, 0.0  ;;  %v1417_v38 = vpop.eup %1416  ;;  %1324 = vmatpush3.msra.mxu0 %v551_v34 }
  0xe4   :  { %188 = vadd.xlane.f32.xlu1 %v187_v37  ;;  %v190_v40 = vsel %vm180_vm2, %v1417_v38, 0.0  ;;  %1347 = vmatprep.subr.mxu0 %v1488_v1 }
  0xe5   :  { %185 = vadd.xlane.f32.xlu0 %v184_v39  ;;  %1326 = vmatmul.mubr.msk.f32.vlgmr.msra.gmra.mxu0 %vm49_vm1, %v1577_v5 }
  0xe6   :  { %1351 = vmatprep.mubr.msk.f32.mxu0 %vm1489_vm0, %v1488_v1 }
  0xe8   :  { %191 = vadd.xlane.f32.xlu1 %v190_v40 }
 0x16a   :  { %v183_v42 = vpop.xlane.xlu0 %182 }
 0x16b   :  { %v202_v46 = vrot.slane %v183_v42, %v201_v43 }
 0x16d   :  { %v189_v44 = vpop.xlane.xlu1 %188 }
 0x16e   :  { %v186_v45 = vpop.xlane.xlu0 %185  ;;  %v210_v48 = vrot.slane %v189_v44, %v201_v43 }
 0x16f   :  { %v206_v47 = vrot.slane %v186_v45, %v201_v43 }
 0x171   :  { %v192_v49 = vpop.xlane.xlu1 %191  ;;  %v216_v50 = vsel %vm215_vm3, %v206_v47, %v202_v46  ;;  %v1196_v46 = vld [vmem:[%s1899_s8 + $0x30] sm:$0xff] }
 0x172   :  { %v214_v51 = vrot.slane %v192_v49, %v201_v43  ;;  %v218_v52 = vsel %vm217_vm4, %v210_v48, %v216_v50  ;;  %v1194_v50 = vld [vmem:[%s1899_s8 + $0x20] sm:$0xff] }
 0x174   :  { %v220_v53 = vsel %vm219_vm5, %v214_v51, %v218_v52  ;;  %v389_v52 = vld [vmem:[%s1897_s6 + $0x38] sm:$0xff] }
 0x175   :  { %v223_v54 = vsel %vm222_vm6, %v220_v53, -inf  ;;  %1292 = vmatpush3.msra.mxu1 %v389_v52  ;;  %v1210_v53 = vld [vmem:[%s1897_s6 + $0xb8] sm:$0xff] }
 0x176   :  { %224 = vmax.xlane.f32.xlu0 %v223_v54  ;;  %1293 = vmatprep.subr.mxu1 %v1488_v1  ;;  %v388_v54 = vld [vmem:[%s1897_s6 + $0x30] sm:$0xff] }
 0x177   :  { %1294 = vmatpush3.msra.mxu1 %v388_v54 }
 0x178   :  { %1295 = vmatprep.subr.mxu1 %v1488_v1 }
 0x1ff   :  { %v225_v59 = vpop.xlane.xlu0 %224 }
 0x200   :  { %v230_v60 = vrot.slane %v225_v59, %v1589_v14  ;;  %v234_v61 = vrot.slane %v225_v59, %v233_v56  ;;  %v238_v62 = vrot.slane %v225_v59, %v237_v57  ;;  %v242_v63 = vrot.slane %v225_v59, %v241_v58  ;;  %v1207_v59 = vld [vmem:[%s1897_s6 + $0xa0] sm:$0xff] }
 0x202   :  { %v247_v0 = vsub.f32 %v183_v42, %v230_v60  ;;  %v248_v2 = vsub.f32 %v186_v45, %v234_v61  ;;  %v249_v3 = vsub.f32 %v189_v44, %v238_v62  ;;  %v250_v7 = vsub.f32 %v192_v49, %v242_v63  ;;  %v1197_v45 = vld [vmem:[%s1899_s8 + $0x38] sm:$0xff]  ;;  %v1195_v49 = vld [vmem:[%s1899_s8 + $0x28] sm:$0xff]  ;;  %v384_v62 = vld [vmem:[%s1897_s6 + $0x10] sm:$0xff] }
 0x203   :  { %v385_v60 = vld [vmem:[%s1897_s6 + $0x18] sm:$0xff]  ;;  %v1205_v63 = vld [vmem:[%s1897_s6 + $0x90] sm:$0xff] }
 0x204   :  { %v251_v4 = vmul.f32 1.442695, %v247_v0  ;;  %v253_v6 = vmul.f32 1.442695, %v248_v2  ;;  %v255_v8 = vmul.f32 1.442695, %v249_v3 }
 0x205   :  { %v257_v9 = vmul.f32 1.442695, %v250_v7  ;;  %v1206_v61 = vld [vmem:[%s1897_s6 + $0x98] sm:$0xff]  ;;  %v383_v0 = vld [vmem:[%s1897_s6 + $0x8] sm:$0xff]  ;;  %v382_v2 = vld [vmem:[%s1897_s6] sm:$0xff] }
 0x206   :  { %1418 = vpow2.f32 %v251_v4  ;;  %v1204_v3 = vld [vmem:[%s1897_s6 + $0x88] sm:$0xff]  ;;  %v1203_v4 = vld [vmem:[%s1897_s6 + $0x80] sm:$0xff] }
 0x207   :  { %1420 = vpow2.f32 %v253_v6  ;;  %v1773_v6 = vpop.f32.mrf.mxu0 }
 0x208   :  { %1422 = vpow2.f32 %v255_v8 }
 0x209   :  { %1424 = vpow2.f32 %v257_v9  ;;  %v1316_v7 = vpop.f32.mrf.mxu0 }
 0x20b   :  { %v1775_v8 = vpop.f32.mrf.mxu0 }
 0x20d   :  { %v1327_v9 = vpop.f32.mrf.mxu0 }
 0x213   :  { %v1419_v11 = vpop.eup %1418 }
 0x214   :  { %v1421_v12 = vpop.eup %1420  ;;  %264 = vperm.xlu1 %1408, %v1419_v11  }
 0x215   :  { %267 = vperm.xlu0 %1409, %v1421_v12   ;;  %v1622_v13 = vpop.eup %1422 }
 0x216   :  { %v1625_v15 = vpop.eup %1424 }
 0x218   :  { %270 = vperm.xlu1 %1408, %v1622_v13  }
 0x21c   :  { %273 = vperm.xlu1 %1408, %v1625_v15  }
 0x28f   :  { %v265_v16 = vpop.permute.xlu1 %264 }
 0x290   :  { %v268_v17 = vpop.permute.xlu0 %267  ;;  %v278_v20 = vrot.slane %v265_v16, %v201_v43 }
 0x291   :  { %v282_v19 = vrot.slane %v268_v17, %v201_v43 }
 0x293   :  { %v271_v18 = vpop.permute.xlu1 %270  ;;  %v291_v23 = vsel %vm215_vm3, %v282_v19, %v278_v20  ;;  %v43_v20 = vld [vmem:[%s1893_s2 + $0x10] sm:$0xff] }
 0x294   :  { %v286_v21 = vrot.slane %v271_v18, %v201_v43 }
 0x296   :  { %v292_v25 = vsel %vm217_vm4, %v286_v21, %v291_v23 }
 0x297   :  { %v274_v22 = vpop.permute.xlu1 %273 }
 0x298   :  { %v290_v24 = vrot.slane %v274_v22, %v201_v43  ;;  %v1180_v43 = vld [vmem:[%s1896_s5 + $0x10] sm:$0xff] }
 0x29a   :  { %v293_v26 = vsel %vm219_vm5, %v290_v24, %v292_v25 }
 0x29b   :  { %v295_v27 = vsel %vm222_vm6, %v293_v26, 0.0 }
 0x29c   :  { %296 = vadd.xlane.f32.xlu1 %v295_v27  ;;  %v44_v27 = vld [vmem:[%s1893_s2 + $0x18] sm:$0xff] }
 0x325   :  { %v297_v35 = vpop.xlane.xlu1 %296 }
 0x326   :  { %v302_v36 = vrot.slane %v297_v35, %v1589_v14  ;;  %v306_v37 = vrot.slane %v297_v35, %v233_v56  ;;  %v310_v38 = vrot.slane %v297_v35, %v237_v57  ;;  %v314_v39 = vrot.slane %v297_v35, %v241_v58  ;;  %v1181_v14 = vld [vmem:[%s1896_s5 + $0x18] sm:$0xff]  ;;  %v387_v56 = vld [vmem:[%s1897_s6 + $0x28] sm:$0xff]  ;;  %v386_v58 = vld [vmem:[%s1897_s6 + $0x20] sm:$0xff] }
 0x327   :  { %1348 = vmatpush3.msra.mxu0 %v1181_v14  ;;  %1296 = vmatpush3.msra.mxu1 %v387_v56  ;;  %v1208_v57 = vld [vmem:[%s1897_s6 + $0xa8] sm:$0xff] }
 0x328   :  { %1426 = vrcp.f32 %v302_v36  ;;  %1349 = vmatprep.subr.mxu0 %v1488_v1  ;;  %1297 = vmatprep.subr.mxu1 %v1488_v1  ;;  %v1187_v56 = vld [vmem:[%s1897_s6 + $0x68] sm:$0xff] }
 0x329   :  { %1428 = vrcp.f32 %v306_v37  ;;  %1350 = vmatpush3.msra.mxu0 %v1180_v43  ;;  %1298 = vmatpush3.msra.mxu1 %v386_v58  ;;  %v1185_v58 = vld [vmem:[%s1897_s6 + $0x58] sm:$0xff] }
 0x32a   :  { %1430 = vrcp.f32 %v310_v38  ;;  %1354 = vmatprep.subr.mxu0 %v1488_v1  ;;  %1352 = vmatmul.mubr.msk.f32.vlgmr.msra.gmra.mxu0 %vm469_vm7, %v1641_v30 }
 0x32b   :  { %1432 = vrcp.f32 %v314_v39  ;;  %1355 = vmatpush3.msra.mxu0 %v1197_v45  ;;  %1362 = vmatprep.mubr.msk.f32.mxu0 %vm1489_vm0, %v1488_v1 }
 0x32c   :  { %1356 = vmatprep.subr.mxu0 %v1488_v1  ;;  %1299 = vmatprep.subr.mxu1 %v1488_v1 }
 0x32d   :  { %1357 = vmatpush3.msra.mxu0 %v1196_v46  ;;  %1300 = vmatpush3.msra.mxu1 %v385_v60  ;;  %v1183_v60 = vld [vmem:[%s1897_s6 + $0x48] sm:$0xff] }
 0x32e   :  { %1358 = vmatprep.subr.mxu0 %v1488_v1  ;;  %1301 = vmatprep.subr.mxu1 %v1488_v1 }
 0x32f   :  { %1359 = vmatpush3.msra.mxu0 %v1195_v49  ;;  %1302 = vmatpush3.msra.mxu1 %v384_v62  ;;  %v1202_v62 = vld [vmem:[%s1896_s5 + $0x28] sm:$0xff] }
 0x330   :  { %1360 = vmatprep.subr.mxu0 %v1488_v1  ;;  %1303 = vmatprep.subr.mxu1 %v1488_v1 }
 0x331   :  { %1361 = vmatpush3.msra.mxu0 %v1194_v50  ;;  %1304 = vmatpush3.msra.mxu1 %v383_v0  ;;  %v1218_v0 = vld [vmem:[%s1899_s8 + $0x58] sm:$0xff] }
 0x332   :  { %1365 = vmatprep.subr.mxu0 %v1488_v1  ;;  %1363 = vmatmul.mubr.msk.f32.vlgmr.msra.gmra.mxu0 %vm49_vm1, %v1577_v5 }
 0x333   :  { %1366 = vmatpush3.msra.mxu0 %v1210_v53  ;;  %1305 = vmatprep.subr.mxu1 %v1488_v1  ;;  %v1189_v53 = vld [vmem:[%s1897_s6 + $0x78] sm:$0xff] }
 0x334   :  { %1367 = vmatprep.subr.mxu0 %v1488_v1  ;;  %1306 = vmatpush3.msra.mxu1 %v382_v2  ;;  %v1217_v2 = vld [vmem:[%s1899_s8 + $0x50] sm:$0xff] }
 0x335   :  { %v1427_v40 = vpop.eup %1426  ;;  %1368 = vmatpush3.msra.mxu0 %v1209_v55  ;;  %1328 = vmatprep.subr.mxu1 %v1488_v1  ;;  %v1188_v55 = vld [vmem:[%s1897_s6 + $0x70] sm:$0xff] }
 0x336   :  { %v320_v41 = vmul.f32 %v1427_v40, %v1419_v11  ;;  %v1429_v42 = vpop.eup %1428  ;;  %1369 = vmatprep.subr.mxu0 %v1488_v1  ;;  %1381 = vmatprep.mubr.msk.f32.mxu0 %vm1489_vm0, %v1488_v1  ;;  %v41_v11 = vld [vmem:[%s1893_s2] sm:$0xff] }
 0x337   :  { %v322_v44 = vmul.f32 %v1429_v42, %v1421_v12  ;;  %v1431_v10 = vpop.eup %1430  ;;  %1370 = vmatpush3.msra.mxu0 %v1208_v57  ;;  %v1186_v57 = vld [vmem:[%s1897_s6 + $0x60] sm:$0xff] }
 0x338   :  { %329 = vperm.xlu0 %1409, %v320_v41   ;;  %v324_v47 = vmul.f32 %v1431_v10, %v1622_v13  ;;  %v1433_v48 = vpop.eup %1432  ;;  %1371 = vmatprep.subr.mxu0 %v1488_v1 }
 0x339   :  { %v326_v51 = vmul.f32 %v1433_v48, %v1625_v15  ;;  %1372 = vmatpush3.msra.mxu0 %v1207_v59  ;;  %v42_v15 = vld [vmem:[%s1893_s2 + $0x8] sm:$0xff]  ;;  %v1184_v59 = vld [vmem:[%s1897_s6 + $0x50] sm:$0xff] }
 0x33a   :  { %1373 = vmatprep.subr.mxu0 %v1488_v1 }
 0x33b   :  { %1374 = vmatpush3.msra.mxu0 %v1206_v61  ;;  %v1182_v61 = vld [vmem:[%s1897_s6 + $0x40] sm:$0xff] }
 0x33c   :  { %334 = vperm.xlu0 %1409, %v322_v44   ;;  %1375 = vmatprep.subr.mxu0 %v1488_v1 }
 0x33d   :  { %1376 = vmatpush3.msra.mxu0 %v1205_v63  ;;  %v1201_v63 = vld [vmem:[%s1896_s5 + $0x20] sm:$0xff] }
 0x33e   :  { %1377 = vmatprep.subr.mxu0 %v1488_v1 }
 0x33f   :  { %1378 = vmatpush3.msra.mxu0 %v1204_v3  ;;  %v1216_v3 = vld [vmem:[%s1899_s8 + $0x48] sm:$0xff] }
 0x340   :  { %339 = vperm.xlu0 %1409, %v324_v47   ;;  %1379 = vmatprep.subr.mxu0 %v1488_v1 }
 0x341   :  { %1380 = vmatpush3.msra.mxu0 %v1203_v4 }
 0x344   :  { %344 = vperm.xlu0 %1409, %v326_v51  }
 0x3b3   :  { %v330_v12 = vpop.permute.xlu0 %329 }
 0x3b4   :  { %v347_v13 = vmul.f32 %v330_v12, %v41_v11 }
 0x3b6   :  { %v352_v16 = vsel %vm351_vm8, %v347_v13, 0.0 }
 0x3b7   :  { %v353_v17 = vrot.slane %v352_v16, 4  ;;  %v335_v18 = vpop.permute.xlu0 %334 }
 0x3b8   :  { %v348_v19 = vmul.f32 %v335_v18, %v42_v15 }
 0x3b9   :  { %v354_v22 = vadd.f32 %v353_v17, %v352_v16 }
 0x3ba   :  { %v359_v21 = vsel %vm351_vm8, %v348_v19, 0.0 }
 0x3bb   :  { %v360_v23 = vrot.slane %v359_v21, 4  ;;  %v340_v24 = vpop.permute.xlu0 %339  ;;  %v355_v29 = vrot.slane %v354_v22, 2 }
 0x3bc   :  { %v349_v25 = vmul.f32 %v340_v24, %v43_v20 }
 0x3bd   :  { %v361_v26 = vadd.f32 %v360_v23, %v359_v21  ;;  %v356_v38 = vadd.f32 %v355_v29, %v354_v22 }
 0x3be   :  { %v366_v28 = vsel %vm351_vm8, %v349_v25, 0.0 }
 0x3bf   :  { %v362_v31 = vrot.slane %v361_v26, 2  ;;  %v367_v32 = vrot.slane %v366_v28, 4  ;;  %v345_v33 = vpop.permute.xlu0 %344  ;;  %v357_v43 = vrot.slane %v356_v38, 1 }
 0x3c0   :  { %v350_v34 = vmul.f32 %v345_v33, %v44_v27 }
 0x3c1   :  { %v363_v35 = vadd.f32 %v362_v31, %v361_v26  ;;  %v368_v36 = vadd.f32 %v367_v32, %v366_v28  ;;  %v358_v48 = vadd.f32 %v357_v43, %v356_v38 }
 0x3c2   :  { %v373_v37 = vsel %vm351_vm8, %v350_v34, 0.0 }
 0x3c3   :  { %v369_v39 = vrot.slane %v368_v36, 2  ;;  %v374_v40 = vrot.slane %v373_v37, 4  ;;  %v364_v41 = vrot.slane %v363_v35, 1 }
 0x3c5   :  { %v370_v42 = vadd.f32 %v369_v39, %v368_v36  ;;  %v375_v14 = vadd.f32 %v374_v40, %v373_v37  ;;  %v365_v45 = vadd.f32 %v364_v41, %v363_v35 }
 0x3c7   :  { %v371_v44 = vrot.slane %v370_v42, 1  ;;  %v376_v10 = vrot.slane %v375_v14, 2  ;;  %v394_v51 = vsel %vm215_vm3, %v365_v45, %v358_v48 }
 0x3c9   :  { %v377_v46 = vadd.f32 %v376_v10, %v375_v14  ;;  %v372_v47 = vadd.f32 %v371_v44, %v370_v42 }
 0x3cb   :  { %v378_v49 = vrot.slane %v377_v46, 1  ;;  %v395_v52 = vsel %vm217_vm4, %v372_v47, %v394_v51 }
 0x3cd   :  { %v379_v50 = vadd.f32 %v378_v49, %v377_v46 }
 0x3cf   :  { %v396_v54 = vsel %vm219_vm5, %v379_v50, %v395_v52 }
 0x3d0   :  { %1308 = vmatmul.mubr.msk.f32.vlgmr.msra.gmra.mxu1 %vm351_vm8, %v396_v54  ;;  %1382 = vmatmul.mubr.msk.f32.vlgmr.msra.gmra.mxu0 %vm351_vm8, %v396_v54  ;;  %1143 = vst.msk [vmem:[#allocation2] sm:$0xf] %vm1142_vm9, %v396_v54 }
 0x3d1   :  { %1329 = vmatpush3.msra.mxu1 %v1189_v53  ;;  %1344 = vmatprep.mubr.msk.f32.mxu1 %vm1489_vm0, %v1488_v1 }
 0x3d2   :  { %1330 = vmatprep.subr.mxu1 %v1488_v1 }
 0x3d3   :  { %1331 = vmatpush3.msra.mxu1 %v1188_v55 }
 0x3d4   :  { %1332 = vmatprep.subr.mxu1 %v1488_v1 }
 0x3d5   :  { %1333 = vmatpush3.msra.mxu1 %v1187_v56 }
 0x3d6   :  { %1334 = vmatprep.subr.mxu1 %v1488_v1 }
 0x3d7   :  { %1335 = vmatpush3.msra.mxu1 %v1186_v57 }
 0x3d8   :  { %1336 = vmatprep.subr.mxu1 %v1488_v1 }
 0x3d9   :  { %1337 = vmatpush3.msra.mxu1 %v1185_v58 }
 0x3da   :  { %1338 = vmatprep.subr.mxu1 %v1488_v1 }
 0x3db   :  { %1339 = vmatpush3.msra.mxu1 %v1184_v59 }
 0x3dc   :  { %1340 = vmatprep.subr.mxu1 %v1488_v1 }
 0x3dd   :  { %1341 = vmatpush3.msra.mxu1 %v1183_v60 }
 0x3de   :  { %1342 = vmatprep.subr.mxu1 %v1488_v1 }
 0x3df   :  { %1343 = vmatpush3.msra.mxu1 %v1182_v61 }
 0x3e0   :  { %1345 = vmatmul.mubr.msk.f32.vlgmr.msra.gmra.mxu1 %vm351_vm8, %v396_v54  ;;  %1384 = vmatprep.subr.mxu1 %v1488_v1 }
 0x3e1   :  { %1385 = vmatpush3.msra.mxu1 %v1202_v62  ;;  %1388 = vmatprep.mubr.msk.f32.mxu1 %vm1489_vm0, %v1488_v1 }
 0x3e2   :  { %1386 = vmatprep.subr.mxu1 %v1488_v1 }
 0x3e3   :  { %1387 = vmatpush3.msra.mxu1 %v1201_v63 }
 0x3e4   :  { %1389 = vmatmul.mubr.msk.f32.vlgmr.msra.gmra.mxu1 %vm469_vm7, %v1641_v30  ;;  %1391 = vmatprep.subr.mxu1 %v1488_v1  ;;  %v1215_v30 = vld [vmem:[%s1899_s8 + $0x40] sm:$0xff] }
 0x3e5   :  { %1392 = vmatpush3.msra.mxu1 %v1218_v0  ;;  %1399 = vmatprep.mubr.msk.f32.mxu1 %vm1489_vm0, %v1488_v1 }
 0x3e6   :  { %1393 = vmatprep.subr.mxu1 %v1488_v1 }
 0x3e7   :  { %1394 = vmatpush3.msra.mxu1 %v1217_v2 }
 0x3e8   :  { %1395 = vmatprep.subr.mxu1 %v1488_v1 }
 0x3e9   :  { %1396 = vmatpush3.msra.mxu1 %v1216_v3 }
 0x3ea   :  { %1397 = vmatprep.subr.mxu1 %v1488_v1  ;;  %v780_v4 = vpop.f32.mrf.mxu0 }
 0x3eb   :  { %1398 = vmatpush3.msra.mxu1 %v1215_v30 }
 0x3ec   :  { %1400 = vmatmul.mubr.msk.f32.vlgmr.msra.gmra.mxu1 %vm49_vm1, %v1577_v5  ;;  %v1353_v7 = vpop.f32.mrf.mxu0 }
 0x3f2   :  { %v872_v9 = vpop.f32.mrf.mxu0 }
 0x3f4   :  { %v1364_v11 = vpop.f32.mrf.mxu0 }
 0x3f5   :  { %1455 = shalt.err (!%p1452_p4)
}
 0x3f6   :  { %1155 = dma.vmem_to_hbm [thread:$0]  %s1153_s13, 64, %s1901_s10, [#allocation3]   ;;  %v1178_v1 = vld [vmem:[%s1900_s9] ss:$0 sm:$0xff]  ;;  %v1199_v23 = vld [vmem:[%s1900_s9 + $0x1] ss:$0 sm:$0xff] }
 0x3f7   :  { %v1177_v13 = vld [vmem:[%s1898_s7] ss:$0 sm:$0xff]  ;;  %v629_v16 = vadd.f32 %v1178_v1, %v1775_v8  ;;  %v1193_v25 = vld [vmem:[%s1898_s7 + $0x1] ss:$0 sm:$0xff]  ;;  %v873_v26 = vadd.f32 %v1199_v23, %v872_v9  ;;  %v1220_v37 = vld [vmem:[%s1900_s9 + $0x2] ss:$0 sm:$0xff] }
 0x3f8   :  { %v1214_v40 = vld [vmem:[%s1898_s7 + $0x2] ss:$0 sm:$0xff]  ;;  %s1493_s25 = smov [#allocation4]   ;;  %vm1144_vm10 = vcmask 257024  }
 0x3f9   :  { %s1162_s26 = sshll.u32 %s1493_s25, 4  ;;  %s1163_s26 = int_to_ptr.vmem [resolvable:$true] %s1162_s26 }
 0x3fa   :  { %s1464_s7 = scalar_lea.vmem %s1163_s26, 64  ;;  %p1469_p6 = scmp.lt.s32.totalorder %s1163_s26, %s1163_s26 }
 0x3fb   :  { %p1465_p5 = scmp.ne.s32.totalorder %s1163_s26, %s1464_s7  ;;  %p1470_p7 = scmp.lt.s32.totalorder %s1464_s7, %s1464_s7 }
 0x3fd   :  { %p1471_p8 = por %p1470_p7, %p1469_p6 }
 0x3ff   :  { %p1472_p9 = pnand %p1471_p8, %p1465_p5 }
 0x490   :  { %v465_v12 = vpop.f32.mrf.mxu1  ;;  %v954_v15 = vpop.f32.mrf.mxu0 }
 0x491   :  { %v540_v17 = vadd.f32 %v1773_v6, %v465_v12 }
 0x492   :  { %v1309_v18 = vpop.f32.mrf.mxu1  ;;  %v1383_v19 = vpop.f32.mrf.mxu0 }
 0x493   :  { %v550_v20 = vadd.f32 %v1177_v13, %v540_v17 }
 0x495   :  { %v1120_v21 = vadd.f32 %v629_v16, %v550_v20 }
 0x497   :  { %v1222_v22 = vmul.f32 -1.442695, %v1120_v21 }
 0x499   :  { %1434 = vpow2.f32 %v1222_v22 }
 0x4a0   :  { %v710_v24 = vpop.f32.mrf.mxu1 }
 0x4a1   :  { %v781_v27 = vadd.f32 %v780_v4, %v710_v24 }
 0x4a2   :  { %v1346_v8 = vpop.f32.mrf.mxu1 }
 0x4a3   :  { %v792_v28 = vadd.f32 %v1193_v25, %v781_v27 }
 0x4a4   :  { %v1024_v6 = vpop.f32.mrf.mxu1 }
 0x4a5   :  { %v1127_v29 = vadd.f32 %v873_v26, %v792_v28  ;;  %v1025_v38 = vadd.f32 %v1024_v6, %v954_v15 }
 0x4a6   :  { %v1435_v31 = vpop.eup %1434  ;;  %v1390_v32 = vpop.f32.mrf.mxu1 }
 0x4a7   :  { %v1124_v33 = vadd.f32 1.0, %v1435_v31  ;;  %v1223_v34 = vmul.f32 -1.442695, %v1127_v29  ;;  %v1036_v14 = vadd.f32 %v1214_v40, %v1025_v38 }
 0x4a9   :  { %1436 = vrcp.f32 %v1124_v33 }
 0x4aa   :  { %1438 = vpow2.f32 %v1223_v34 }
 0x4ac   :  { %v1116_v35 = vpop.f32.mrf.mxu1 }
 0x4ad   :  { %v1117_v39 = vadd.f32 %v1220_v37, %v1116_v35 }
 0x4ae   :  { %v1401_v36 = vpop.f32.mrf.mxu1 }
 0x4b6   :  { %v1437_v41 = vpop.eup %1436 }
 0x4b7   :  { %v1439_v42 = vpop.eup %1438  ;;  %v1134_v43 = vmul.f32 %v1437_v41, %v1117_v39 }
 0x4b8   :  { %v1131_v44 = vadd.f32 1.0, %v1439_v42 }
 0x4b9   :  { %v1135_v10 = vadd.f32 %v1134_v43, %v1036_v14 }
 0x4ba   :  { %1440 = vrcp.f32 %v1131_v44 }
 0x4bb   :  { %1442 = vtanh.f32 %v1135_v10 }
 0x4c7   :  { %v1441_v45 = vpop.eup %1440 }
 0x4c8   :  { %v1443_v46 = vpop.eup %1442  ;;  %v1137_v47 = vsub.f32 1.0, %v1441_v45  ;;  %v1139_v49 = vmul.f32 %v1441_v45, %v1577_v5 }
 0x4ca   :  { %v1138_v48 = vmul.f32 %v1443_v46, %v1137_v47 }
 0x4cc   :  { %v1140_v50 = vadd.f32 %v1139_v49, %v1138_v48 }
 0x4ce   :  { %1145 = vst.msk [vmem:[#allocation4] sm:$0xf] %vm1144_vm10, %v1140_v50 }
 0x4cf   :  { %1475 = shalt.err (!%p1472_p9)
}
 0x4d0   :  { %1165 = dma.vmem_to_hbm [thread:$0]  %s1163_s26, 64, %s1902_s11, [#allocation5]  }
 0x4d1   :  { %1484 = dma.done.wait [#allocation3], 64  }
 0x4d2   :  { %1485 = vsyncadd [#allocation3], 4294967232 }
 0x4d3   :  { %1486 = dma.done.wait [#allocation5], 64  }
 0x4d4   :  { %1487 = vsyncadd [#allocation5], 4294967232 }
 0x4d5   :  { %1172 = vsyncpa [#allocation3], 1 }
 0x4d6   :  { %1173 = vsyncpa [#allocation5], 1 }

</bundles_post_ra>
